<compile_context>
chip_gen: v7x
topology: tpu7x:2x2x1
jax: 0.10.0
libtpu: 0.0.40
codegen_flags: <defaults>
</compile_context>

<pallas_src>
import math
import jax
import jax.numpy as jnp
from jax.experimental import pallas as pl
from jax.experimental.pallas import tpu as pltpu


def _make_conv_kernel(H, W, B, Cin, Cinp, Cout, P0, neg_slope=0.01):
    """Build a Pallas kernel body specialized to static shapes."""
    L = H * W
    BL = B * L
    Kp = 9 * Cinp

    def conv_kernel(x_ref, w_ref, b_ref, m_ref, o_ref, xpad_ref, patch_ref):
        # x_ref    : (Cin, B*L)    planar batched image, lanes = b*L + h*W + w
        # w_ref    : (Cout, Kp)    im2col weights (channel-padded)
        # b_ref    : (Cout, 1)     bias
        # m_ref    : (9, B*L)      per-tap border masks (1.0 valid / 0.0 pad)
        # o_ref    : (B, Cout, L)  NCHW-flat output
        # xpad_ref : (Cinp, P0 + B*L + W + 1)  VMEM: zero-haloed, channel-padded image
        # patch_ref: (Kp, B*L)                 VMEM: im2col matrix

        # Zero the whole haloed buffer (halos + padded channel rows), then
        # drop the batched image in after the lane-aligned left halo.
        xpad_ref[...] = jnp.zeros_like(xpad_ref)
        xpad_ref[0:Cin, pl.ds(P0, BL)] = x_ref[...].astype(jnp.float32)

        # Build the (9*Cinp, B*L) im2col matrix: each 3x3 tap is a static
        # lane-offset slice of the haloed image.  All 8 non-center taps are
        # masked because adjacent images share the lane axis (a border read
        # may land in the neighbouring image, not in a zero halo).
        for kh in range(3):
            for kw in range(3):
                dh, dw = kh - 1, kw - 1
                tap = kh * 3 + kw
                delta = dh * W + dw                            # flat-index shift
                shifted = xpad_ref[:, pl.ds(P0 + delta, BL)]   # (Cinp, B*L)
                if not (dh == 0 and dw == 0):
                    shifted = shifted * m_ref[tap:tap + 1, :]
                # Cinp is a sublane multiple -> aligned, unmasked full-tile store.
                patch_ref[pl.ds(tap * Cinp, Cinp), :] = shifted

        # Single im2col matmul on the MXU over the whole batch:
        # (Cout, Kp) @ (Kp, B*L) -> (Cout, B*L).
        acc = jnp.dot(w_ref[...], patch_ref[...],
                      preferred_element_type=jnp.float32)
        acc = acc + b_ref[...]                            # bias (broadcast over lanes)
        acc = jnp.where(acc >= 0, acc, neg_slope * acc)   # LeakyReLU(0.01)
        for b in range(B):                                # 128-aligned lane-dense stores
            o_ref[b] = acc[:, b * L:(b + 1) * L].astype(o_ref.dtype)

    return conv_kernel


def output_forward(x, weight, bias):
    """Forward pass matching PyTorch `Output.forward`.

    Args:
      x:      (B, L, C) float32, L must be a perfect square.
      weight: (Cout, Cin, 3, 3) float32   (PyTorch Conv2d layout)
      bias:   (Cout,) float32
    Returns:
      (B, Cout, H, W) float32  (NCHW, same as the PyTorch module)
    """
    B, L, C = x.shape
    H = math.isqrt(L)
    W = H
    assert H * W == L, "L must be a perfect square"
    Cout, Cin, KH, KW = weight.shape
    assert Cin == C and KH == 3 and KW == 3

    BL = B * L
    Cinp = ((Cin + 7) // 8) * 8               # pad channels to the sublane width
    Kp = 9 * Cinp                             # im2col K (already sublane-aligned)
    P0 = ((W + 1 + 127) // 128) * 128         # lane-aligned left halo width

    # The module's own transpose(1, 2), expressed as a single planar-batched
    # layout change: (B, L, C) -> (C, B*L).  allow_input_fusion lets XLA fuse
    # this into the pallas_call input DMA (no separate HBM round trip).
    x_planar = jnp.transpose(x, (2, 0, 1)).reshape(C, BL)

    # Conv weights -> channel-padded im2col layout (Cout, 9*Cinp): tap-major,
    # then channel; padded channels get zero weights (numerically inert).
    w_pad = jnp.pad(weight, ((0, 0), (0, Cinp - Cin), (0, 0), (0, 0)))
    w_mat = jnp.transpose(w_pad, (0, 2, 3, 1)).reshape(Cout, Kp)
    b2d = bias.reshape(Cout, 1)

    # Per-tap validity masks over the flattened spatial axis, tiled over batch.
    hh = jnp.arange(H)
    ww = jnp.arange(W)
    masks = []
    for kh in range(3):
        for kw in range(3):
            vh = ((hh + kh - 1) >= 0) & ((hh + kh - 1) < H)
            vw = ((ww + kw - 1) >= 0) & ((ww + kw - 1) < W)
            masks.append((vh[:, None] & vw[None, :]).reshape(L))
    mask_arr = jnp.stack(masks).astype(jnp.float32)       # (9, L)
    mask_full = jnp.tile(mask_arr, (1, B))                 # (9, B*L)

    kernel = _make_conv_kernel(H, W, B, Cin, Cinp, Cout, P0)

    flops = 2 * BL * (9 * Cin) * Cout
    bytes_accessed = 4 * (x.size + w_mat.size + b2d.size + mask_full.size
                          + B * Cout * L)

    out_flat = pl.pallas_call(
        kernel,
        out_shape=jax.ShapeDtypeStruct((B, Cout, L), x.dtype),
        grid_spec=pltpu.PrefetchScalarGridSpec(
            num_scalar_prefetch=0,
            grid=(1,),                                        # single step, whole batch
            in_specs=[
                pl.BlockSpec((Cin, BL), lambda i: (0, 0)),    # planar batched image
                pl.BlockSpec((Cout, Kp), lambda i: (0, 0)),   # weights
                pl.BlockSpec((Cout, 1), lambda i: (0, 0)),    # bias
                pl.BlockSpec((9, BL), lambda i: (0, 0)),      # border masks
            ],
            out_specs=pl.BlockSpec((B, Cout, L), lambda i: (0, 0, 0)),
            scratch_shapes=[
                pltpu.VMEM((Cinp, P0 + BL + W + 1), jnp.float32),  # haloed image
                pltpu.VMEM((Kp, BL), jnp.float32),                 # im2col matrix
            ],
        ),
        compiler_params=pltpu.CompilerParams(
            dimension_semantics=("arbitrary",),
            allow_input_fusion=[True, False, False, False]),
        cost_estimate=pl.CostEstimate(
            flops=flops, transcendentals=0, bytes_accessed=bytes_accessed),
    )(x_planar, w_mat, b2d, mask_full)

    # Output is already NCHW-flat: free reshape, no transpose.
    return out_flat.reshape(B, Cout, H, W)


if __name__ == "__main__":
    # Small shapes consistent with the module: B=2, L=16*16, inchans=4, outchans=8.
    B, H, W = 2, 16, 16
    Cin, Cout = 4, 8
    L = H * W

    key = jax.random.PRNGKey(0)
    kx, kw, kb = jax.random.split(key, 3)

    x = jax.random.normal(kx, (B, L, Cin), dtype=jnp.float32)

    # Deterministic Conv2d parameter init (PyTorch-style uniform bounds).
    fan_in = Cin * 3 * 3
    bound = 1.0 / math.sqrt(fan_in)
    weight = jax.random.uniform(kw, (Cout, Cin, 3, 3), jnp.float32, -bound, bound)
    bias = jax.random.uniform(kb, (Cout,), jnp.float32, -bound, bound)

    out = jax.jit(output_forward)(x, weight, bias)
    jax.block_until_ready(out)
    assert out.shape == (B, Cout, H, W)

    # Pure-JAX reference matching the PyTorch module (correctness gate).
    x_nchw = jnp.transpose(x, (0, 2, 1)).reshape(B, Cin, H, W)
    ref = jax.lax.conv_general_dilated(
        x_nchw, weight, window_strides=(1, 1), padding=((1, 1), (1, 1)),
        dimension_numbers=("NCHW", "OIHW", "NCHW"),
        precision=jax.lax.Precision.HIGHEST)
    ref = ref + bias[None, :, None, None]
    ref = jnp.where(ref >= 0, ref, 0.01 * ref)
    err = float(jnp.max(jnp.abs(out - ref)))
    assert err < 1e-3, f"max abs error vs reference: {err}"

    print("KERNEL_OK")
</pallas_src>

<mosaic_0001>
module attributes {stable_mosaic.version = 11 : i64} {
  func.func @conv_kernel(%arg0: i32, %arg1: memref<4x512xf32, #tpu.memory_space<vmem>>, %arg2: memref<8x72xf32, #tpu.memory_space<vmem>>, %arg3: memref<8x1xf32, #tpu.memory_space<vmem>>, %arg4: memref<9x512xf32, #tpu.memory_space<vmem>>, %arg5: memref<2x8x256xf32, #tpu.memory_space<vmem>>, %arg6: memref<8x657xf32, #tpu.memory_space<vmem>>, %arg7: memref<72x512xf32, #tpu.memory_space<vmem>>) attributes {dimension_semantics = [#tpu.dimension_semantics<arbitrary>], iteration_bounds = array<i64: 1>, scalar_prefetch = 0 : i64, scratch_operands = 2 : i64, tpu.core_type = #tpu.core_type<tc>, window_params = [{pipeline_mode = #tpu.pipeline_mode<synchronous>, transform_indices = @transform_0, window_bounds = array<i64: 4, 512>}, {pipeline_mode = #tpu.pipeline_mode<synchronous>, transform_indices = @transform_1, window_bounds = array<i64: 8, 72>}, {pipeline_mode = #tpu.pipeline_mode<synchronous>, transform_indices = @transform_2, window_bounds = array<i64: 8, 1>}, {pipeline_mode = #tpu.pipeline_mode<synchronous>, transform_indices = @transform_3, window_bounds = array<i64: 9, 512>}, {pipeline_mode = #tpu.pipeline_mode<synchronous>, transform_indices = @transform_4, window_bounds = array<i64: 2, 8, 256>}]} {
    %cst = arith.constant 0.000000e+00 : f32
    %0 = vector.broadcast %cst : f32 to vector<8x657xf32>
    %c0 = arith.constant 0 : index
    %c0_0 = arith.constant 0 : index
    %1 = vector.load %arg6[%c0, %c0_0] : memref<8x657xf32, #tpu.memory_space<vmem>>, vector<8x657xf32>
    tpu.vector_store %arg6[%c0, %c0_0], %0 {strides = array<i32>} : memref<8x657xf32, #tpu.memory_space<vmem>>, vector<8x657xf32>,
    %c0_1 = arith.constant 0 : index
    %c0_2 = arith.constant 0 : index
    %2 = vector.load %arg1[%c0_1, %c0_2] : memref<4x512xf32, #tpu.memory_space<vmem>>, vector<4x512xf32>
    %c0_3 = arith.constant 0 : index
    %c128 = arith.constant 128 : index
    %3 = vector.load %arg6[%c0_3, %c128] : memref<8x657xf32, #tpu.memory_space<vmem>>, vector<4x512xf32>
    tpu.vector_store %arg6[%c0_3, %c128], %2 {strides = array<i32>} : memref<8x657xf32, #tpu.memory_space<vmem>>, vector<4x512xf32>,
    %c0_4 = arith.constant 0 : index
    %c111 = arith.constant 111 : index
    %4 = vector.load %arg6[%c0_4, %c111] : memref<8x657xf32, #tpu.memory_space<vmem>>, vector<8x512xf32>
    %c0_5 = arith.constant 0 : index
    %c0_6 = arith.constant 0 : index
    %5 = vector.load %arg4[%c0_5, %c0_6] : memref<9x512xf32, #tpu.memory_space<vmem>>, vector<1x512xf32>
    %6 = vector.broadcast %5 : vector<1x512xf32> to vector<8x512xf32>
    %7 = arith.mulf %4, %6 : vector<8x512xf32>
    %c0_7 = arith.constant 0 : index
    %c0_8 = arith.constant 0 : index
    %8 = vector.load %arg7[%c0_7, %c0_8] : memref<72x512xf32, #tpu.memory_space<vmem>>, vector<8x512xf32>
    tpu.vector_store %arg7[%c0_7, %c0_8], %7 {strides = array<i32>} : memref<72x512xf32, #tpu.memory_space<vmem>>, vector<8x512xf32>,
    %c0_9 = arith.constant 0 : index
    %c112 = arith.constant 112 : index
    %9 = vector.load %arg6[%c0_9, %c112] : memref<8x657xf32, #tpu.memory_space<vmem>>, vector<8x512xf32>
    %c1 = arith.constant 1 : index
    %c0_10 = arith.constant 0 : index
    %10 = vector.load %arg4[%c1, %c0_10] : memref<9x512xf32, #tpu.memory_space<vmem>>, vector<1x512xf32>
    %11 = vector.broadcast %10 : vector<1x512xf32> to vector<8x512xf32>
    %12 = arith.mulf %9, %11 : vector<8x512xf32>
    %c8 = arith.constant 8 : index
    %c0_11 = arith.constant 0 : index
    %13 = vector.load %arg7[%c8, %c0_11] : memref<72x512xf32, #tpu.memory_space<vmem>>, vector<8x512xf32>
    tpu.vector_store %arg7[%c8, %c0_11], %12 {strides = array<i32>} : memref<72x512xf32, #tpu.memory_space<vmem>>, vector<8x512xf32>,
    %c0_12 = arith.constant 0 : index
    %c113 = arith.constant 113 : index
    %14 = vector.load %arg6[%c0_12, %c113] : memref<8x657xf32, #tpu.memory_space<vmem>>, vector<8x512xf32>
    %c2 = arith.constant 2 : index
    %c0_13 = arith.constant 0 : index
    %15 = vector.load %arg4[%c2, %c0_13] : memref<9x512xf32, #tpu.memory_space<vmem>>, vector<1x512xf32>
    %16 = vector.broadcast %15 : vector<1x512xf32> to vector<8x512xf32>
    %17 = arith.mulf %14, %16 : vector<8x512xf32>
    %c16 = arith.constant 16 : index
    %c0_14 = arith.constant 0 : index
    %18 = vector.load %arg7[%c16, %c0_14] : memref<72x512xf32, #tpu.memory_space<vmem>>, vector<8x512xf32>
    tpu.vector_store %arg7[%c16, %c0_14], %17 {strides = array<i32>} : memref<72x512xf32, #tpu.memory_space<vmem>>, vector<8x512xf32>,
    %c0_15 = arith.constant 0 : index
    %c127 = arith.constant 127 : index
    %19 = vector.load %arg6[%c0_15, %c127] : memref<8x657xf32, #tpu.memory_space<vmem>>, vector<8x512xf32>
    %c3 = arith.constant 3 : index
    %c0_16 = arith.constant 0 : index
    %20 = vector.load %arg4[%c3, %c0_16] : memref<9x512xf32, #tpu.memory_space<vmem>>, vector<1x512xf32>
    %21 = vector.broadcast %20 : vector<1x512xf32> to vector<8x512xf32>
    %22 = arith.mulf %19, %21 : vector<8x512xf32>
    %c24 = arith.constant 24 : index
    %c0_17 = arith.constant 0 : index
    %23 = vector.load %arg7[%c24, %c0_17] : memref<72x512xf32, #tpu.memory_space<vmem>>, vector<8x512xf32>
    tpu.vector_store %arg7[%c24, %c0_17], %22 {strides = array<i32>} : memref<72x512xf32, #tpu.memory_space<vmem>>, vector<8x512xf32>,
    %c0_18 = arith.constant 0 : index
    %c128_19 = arith.constant 128 : index
    %24 = vector.load %arg6[%c0_18, %c128_19] : memref<8x657xf32, #tpu.memory_space<vmem>>, vector<8x512xf32>
    %c32 = arith.constant 32 : index
    %c0_20 = arith.constant 0 : index
    %25 = vector.load %arg7[%c32, %c0_20] : memref<72x512xf32, #tpu.memory_space<vmem>>, vector<8x512xf32>
    tpu.vector_store %arg7[%c32, %c0_20], %24 {strides = array<i32>} : memref<72x512xf32, #tpu.memory_space<vmem>>, vector<8x512xf32>,
    %c0_21 = arith.constant 0 : index
    %c129 = arith.constant 129 : index
    %26 = vector.load %arg6[%c0_21, %c129] : memref<8x657xf32, #tpu.memory_space<vmem>>, vector<8x512xf32>
    %c5 = arith.constant 5 : index
    %c0_22 = arith.constant 0 : index
    %27 = vector.load %arg4[%c5, %c0_22] : memref<9x512xf32, #tpu.memory_space<vmem>>, vector<1x512xf32>
    %28 = vector.broadcast %27 : vector<1x512xf32> to vector<8x512xf32>
    %29 = arith.mulf %26, %28 : vector<8x512xf32>
    %c40 = arith.constant 40 : index
    %c0_23 = arith.constant 0 : index
    %30 = vector.load %arg7[%c40, %c0_23] : memref<72x512xf32, #tpu.memory_space<vmem>>, vector<8x512xf32>
    tpu.vector_store %arg7[%c40, %c0_23], %29 {strides = array<i32>} : memref<72x512xf32, #tpu.memory_space<vmem>>, vector<8x512xf32>,
    %c0_24 = arith.constant 0 : index
    %c143 = arith.constant 143 : index
    %31 = vector.load %arg6[%c0_24, %c143] : memref<8x657xf32, #tpu.memory_space<vmem>>, vector<8x512xf32>
    %c6 = arith.constant 6 : index
    %c0_25 = arith.constant 0 : index
    %32 = vector.load %arg4[%c6, %c0_25] : memref<9x512xf32, #tpu.memory_space<vmem>>, vector<1x512xf32>
    %33 = vector.broadcast %32 : vector<1x512xf32> to vector<8x512xf32>
    %34 = arith.mulf %31, %33 : vector<8x512xf32>
    %c48 = arith.constant 48 : index
    %c0_26 = arith.constant 0 : index
    %35 = vector.load %arg7[%c48, %c0_26] : memref<72x512xf32, #tpu.memory_space<vmem>>, vector<8x512xf32>
    tpu.vector_store %arg7[%c48, %c0_26], %34 {strides = array<i32>} : memref<72x512xf32, #tpu.memory_space<vmem>>, vector<8x512xf32>,
    %c0_27 = arith.constant 0 : index
    %c144 = arith.constant 144 : index
    %36 = vector.load %arg6[%c0_27, %c144] : memref<8x657xf32, #tpu.memory_space<vmem>>, vector<8x512xf32>
    %c7 = arith.constant 7 : index
    %c0_28 = arith.constant 0 : index
    %37 = vector.load %arg4[%c7, %c0_28] : memref<9x512xf32, #tpu.memory_space<vmem>>, vector<1x512xf32>
    %38 = vector.broadcast %37 : vector<1x512xf32> to vector<8x512xf32>
    %39 = arith.mulf %36, %38 : vector<8x512xf32>
    %c56 = arith.constant 56 : index
    %c0_29 = arith.constant 0 : index
    %40 = vector.load %arg7[%c56, %c0_29] : memref<72x512xf32, #tpu.memory_space<vmem>>, vector<8x512xf32>
    tpu.vector_store %arg7[%c56, %c0_29], %39 {strides = array<i32>} : memref<72x512xf32, #tpu.memory_space<vmem>>, vector<8x512xf32>,
    %c0_30 = arith.constant 0 : index
    %c145 = arith.constant 145 : index
    %41 = vector.load %arg6[%c0_30, %c145] : memref<8x657xf32, #tpu.memory_space<vmem>>, vector<8x512xf32>
    %c8_31 = arith.constant 8 : index
    %c0_32 = arith.constant 0 : index
    %42 = vector.load %arg4[%c8_31, %c0_32] : memref<9x512xf32, #tpu.memory_space<vmem>>, vector<1x512xf32>
    %43 = vector.broadcast %42 : vector<1x512xf32> to vector<8x512xf32>
    %44 = arith.mulf %41, %43 : vector<8x512xf32>
    %c64 = arith.constant 64 : index
    %c0_33 = arith.constant 0 : index
    %45 = vector.load %arg7[%c64, %c0_33] : memref<72x512xf32, #tpu.memory_space<vmem>>, vector<8x512xf32>
    tpu.vector_store %arg7[%c64, %c0_33], %44 {strides = array<i32>} : memref<72x512xf32, #tpu.memory_space<vmem>>, vector<8x512xf32>,
    %c0_34 = arith.constant 0 : index
    %c0_35 = arith.constant 0 : index
    %46 = vector.load %arg2[%c0_34, %c0_35] : memref<8x72xf32, #tpu.memory_space<vmem>>, vector<8x72xf32>
    %c0_36 = arith.constant 0 : index
    %c0_37 = arith.constant 0 : index
    %47 = vector.load %arg7[%c0_36, %c0_37] : memref<72x512xf32, #tpu.memory_space<vmem>>, vector<72x512xf32>
    %cst_38 = arith.constant dense<0.000000e+00> : vector<8x512xf32>
    %48 = tpu.matmul %46, %47, %cst_38 {dimension_numbers = #tpu.dot_dimension_numbers<[1], [0], [0], [1], [0, 0, 1, 1], [], []>} : vector<8x72xf32>, vector<72x512xf32>, vector<8x512xf32> -> vector<8x512xf32>
    %c0_39 = arith.constant 0 : index
    %c0_40 = arith.constant 0 : index
    %49 = vector.load %arg3[%c0_39, %c0_40] : memref<8x1xf32, #tpu.memory_space<vmem>>, vector<8x1xf32>
    %50 = vector.broadcast %49 : vector<8x1xf32> to vector<8x512xf32>
    %51 = arith.addf %48, %50 : vector<8x512xf32>
    %cst_41 = arith.constant 0.000000e+00 : f32
    %52 = vector.broadcast %cst_41 : f32 to vector<8x512xf32>
    %53 = arith.cmpf oge, %51, %52 : vector<8x512xf32>
    %cst_42 = arith.constant 0.00999999977 : f32
    %54 = vector.broadcast %cst_42 : f32 to vector<8x512xf32>
    %55 = arith.mulf %54, %51 : vector<8x512xf32>
    %56 = arith.select %53, %51, %55 : vector<8x512xi1>, vector<8x512xf32>
    %57 = vector.extract_strided_slice %56 {offsets = [0, 0], sizes = [8, 256], strides = [1, 1]} : vector<8x512xf32> to vector<8x256xf32>
    %c0_43 = arith.constant 0 : index
    %c0_44 = arith.constant 0 : index
    %c0_45 = arith.constant 0 : index
    %58 = vector.load %arg5[%c0_43, %c0_44, %c0_45] : memref<2x8x256xf32, #tpu.memory_space<vmem>>, vector<1x8x256xf32>
    %59 = vector.shape_cast %58 : vector<1x8x256xf32> to vector<8x256xf32>
    %60 = vector.shape_cast %57 : vector<8x256xf32> to vector<1x8x256xf32>
    tpu.vector_store %arg5[%c0_43, %c0_44, %c0_45], %60 {strides = array<i32>} : memref<2x8x256xf32, #tpu.memory_space<vmem>>, vector<1x8x256xf32>,
    %61 = vector.extract_strided_slice %56 {offsets = [0, 256], sizes = [8, 256], strides = [1, 1]} : vector<8x512xf32> to vector<8x256xf32>
    %c1_46 = arith.constant 1 : index
    %c0_47 = arith.constant 0 : index
    %c0_48 = arith.constant 0 : index
    %62 = vector.load %arg5[%c1_46, %c0_47, %c0_48] : memref<2x8x256xf32, #tpu.memory_space<vmem>>, vector<1x8x256xf32>
    %63 = vector.shape_cast %62 : vector<1x8x256xf32> to vector<8x256xf32>
    %64 = vector.shape_cast %61 : vector<8x256xf32> to vector<1x8x256xf32>
    tpu.vector_store %arg5[%c1_46, %c0_47, %c0_48], %64 {strides = array<i32>} : memref<2x8x256xf32, #tpu.memory_space<vmem>>, vector<1x8x256xf32>,
    return
  }
  func.func @transform_0(%arg0: i32) -> (i32, i32) {
    %c0_i32 = arith.constant 0 : i32
    %c0_i32_0 = arith.constant 0 : i32
    %c0_i32_1 = arith.constant 0 : i32
    return %c0_i32, %c0_i32_0 : i32, i32
  }
  func.func @transform_1(%arg0: i32) -> (i32, i32) {
    %c0_i32 = arith.constant 0 : i32
    %c0_i32_0 = arith.constant 0 : i32
    %c0_i32_1 = arith.constant 0 : i32
    return %c0_i32, %c0_i32_0 : i32, i32
  }
  func.func @transform_2(%arg0: i32) -> (i32, i32) {
    %c0_i32 = arith.constant 0 : i32
    %c0_i32_0 = arith.constant 0 : i32
    %c0_i32_1 = arith.constant 0 : i32
    return %c0_i32, %c0_i32_0 : i32, i32
  }
  func.func @transform_3(%arg0: i32) -> (i32, i32) {
    %c0_i32 = arith.constant 0 : i32
    %c0_i32_0 = arith.constant 0 : i32
    %c0_i32_1 = arith.constant 0 : i32
    return %c0_i32, %c0_i32_0 : i32, i32
  }
  func.func @transform_4(%arg0: i32) -> (i32, i32, i32) {
    %c0_i32 = arith.constant 0 : i32
    %c0_i32_0 = arith.constant 0 : i32
    %c0_i32_1 = arith.constant 0 : i32
    %c0_i32_2 = arith.constant 0 : i32
    return %c0_i32, %c0_i32_0, %c0_i32_1 : i32, i32, i32
  }
}

</mosaic_0001>

<bundles_post_ra>
// kernel: output_forward.1
= control target key start
LH: loop header
LB: loop body
LE: loop exit
PB: predicated region body
PF: predicated region fallthrough
CT: control target
= control target key end

     0   :  { %v43_v0 = vlaneseq  ;;  %v962_v1 = vmov 0.0   ;;  %s963_s21 = smov 111   ;;  %vm22_vm0 = vcmask 138240   ;;  %s965_s26 = smov 113   ;;  %vm67_vm1 = vcmask 908288   ;;  %s1299_s3 = inlined_call_operand.vmem [shape: f32[9,512], index: 3, kind: input, shape index: {}]   ;;  %s1300_s0 = inlined_call_operand.vmem [shape: f32[4,512], index: 0, kind: input, shape index: {}]   ;;  %s1301_s2 = inlined_call_operand.vmem [shape: f32[8,1], index: 2, kind: input, shape index: {}]   ;;  %s1302_s1 = inlined_call_operand.vmem [shape: f32[8,72], index: 1, kind: input, shape index: {}]   ;;  %s1303_s4 = inlined_call_operand.vmem [shape: f32[2,8,256], index: 4, kind: output, shape index: {}]  }
   0x1   :  { %18 = vst [vmem:[#allocation2 + $0x8] sm:$0xff] %v962_v1  ;;  %19 = vst [vmem:[#allocation2 + $0x10] sm:$0xff] %v962_v1  ;;  %737 = vmatprep.mubr.f32.mxu0 %v962_v1  ;;  %808 = vmatprep.mubr.f32.mxu1 %v962_v1  ;;  %v41_v3 = vld [vmem:[%s1299_s3] ss:$8 sm:$0xf]  ;;  %s966_s29 = smov 127  }
   0x2   :  { %20 = vst [vmem:[#allocation2 + $0x18] sm:$0xff] %v962_v1  ;;  %21 = vst [vmem:[#allocation2 + $0x20] sm:$0xff] %v962_v1  ;;  %v44_v2 = vshrl.u32 %v43_v0, 7  ;;  %v25_v4 = vld [vmem:[%s1300_s0 + $0x8] sm:$0xff]  ;;  %v24_v12 = vld [vmem:[%s1300_s0] sm:$0xff]  ;;  %s964_s0 = smov 112  }
   0x3   :  { %34 = vst [vmem:[#allocation2 + $0x18] sm:$0xf] %v25_v4  ;;  %v29_v9 = vcombine.high %v25_v4, %v25_v4  ;;  %32 = vst [vmem:[#allocation2 + $0x8] sm:$0xf] %v24_v12  ;;  %v28_v18 = vcombine.high %v24_v12, %v24_v12  ;;  %s967_s6 = smov 1   ;;  %s968_s9 = smov 15  }
   0x4   :  { %v1003_v5 = vsub.s32 2, %v44_v2  ;;  %v1005_v6 = vsub.s32 0, %v44_v2  ;;  %v1007_v7 = vsub.s32 3, %v44_v2  ;;  %v1009_v8 = vsub.s32 1, %v44_v2  ;;  %23 = vst.msk [vmem:[#allocation2 + $0x28] sm:$0xff] %vm22_vm0, %v962_v1  ;;  %s969_s12 = smov 16  }
   0x5   :  { %35 = vst [vmem:[#allocation2 + $0x20] sm:$0xf] %v29_v9  ;;  %v836_v15 = vld [vmem:[%s1299_s3 + $0x1] ss:$8 sm:$0xf]  ;;  %s970_s15 = smov 17  }
   0x6   :  { %v54_v10 = vrot.slane %v41_v3, %v1003_v5  ;;  %v46_v11 = vrot.slane %v41_v3, %v1005_v6  ;;  %v58_v13 = vrot.slane %v41_v3, %v1007_v7  ;;  %v50_v14 = vrot.slane %v41_v3, %v1009_v8  ;;  %33 = vst [vmem:[#allocation2 + $0x10] sm:$0xf] %v28_v18  ;;  %v837_v21 = vld [vmem:[%s1299_s3 + $0x2] ss:$8 sm:$0xf] }
   0x7   :  { %v123_v16 = vrot.slane %v836_v15, %v1009_v8  ;;  %v119_v17 = vrot.slane %v836_v15, %v1005_v6  ;;  %v131_v19 = vrot.slane %v836_v15, %v1007_v7  ;;  %v127_v20 = vrot.slane %v836_v15, %v1003_v5  ;;  %v838_v26 = vld [vmem:[%s1299_s3 + $0x3] ss:$8 sm:$0xf]  ;;  %v839_v31 = vld [vmem:[%s1299_s3 + $0x5] ss:$8 sm:$0xf] }
   0x8   :  { %63 = vrot.lane.b32.xlu1 %v54_v10, %s963_s21  ;;  %59 = vrot.lane.b32.xlu0 %v46_v11, %s963_s21  ;;  %v197_v22 = vrot.slane %v837_v21, %v1009_v8  ;;  %v193_v23 = vrot.slane %v837_v21, %v1005_v6  ;;  %v205_v24 = vrot.slane %v837_v21, %v1007_v7  ;;  %v840_v36 = vld [vmem:[%s1299_s3 + $0x6] ss:$8 sm:$0xf]  ;;  %v841_v41 = vld [vmem:[%s1299_s3 + $0x7] ss:$8 sm:$0xf] }
   0x9   :  { %v201_v25 = vrot.slane %v837_v21, %v1003_v5  ;;  %v271_v27 = vrot.slane %v838_v26, %v1009_v8  ;;  %v267_v28 = vrot.slane %v838_v26, %v1005_v6  ;;  %v279_v29 = vrot.slane %v838_v26, %v1007_v7  ;;  %v842_v46 = vld [vmem:[%s1299_s3 + $0x20] ss:$8 sm:$0xf] }
   0xa   :  { %v275_v30 = vrot.slane %v838_v26, %v1003_v5  ;;  %v353_v32 = vrot.slane %v839_v31, %v1009_v8  ;;  %v349_v33 = vrot.slane %v839_v31, %v1005_v6  ;;  %v361_v34 = vrot.slane %v839_v31, %v1007_v7 }
   0xb   :  { %v357_v35 = vrot.slane %v839_v31, %v1003_v5  ;;  %v425_v37 = vrot.slane %v840_v36, %v1009_v8  ;;  %v421_v38 = vrot.slane %v840_v36, %v1005_v6  ;;  %v433_v39 = vrot.slane %v840_v36, %v1007_v7 }
   0xc   :  { %65 = vrot.lane.b32.xlu1 %v58_v13, %s963_s21  ;;  %61 = vrot.lane.b32.xlu0 %v50_v14, %s963_s21  ;;  %v429_v40 = vrot.slane %v840_v36, %v1003_v5  ;;  %v497_v42 = vrot.slane %v841_v41, %v1009_v8  ;;  %v493_v43 = vrot.slane %v841_v41, %v1005_v6  ;;  %v1128_v14 = vld [vmem:[#allocation2 + $0x18] sm:$0xff]  ;;  %v1130_v15 = vld [vmem:[#allocation2 + $0x20] sm:$0xff]  ;;  %vm140_vm2 = vcmask 916480  }
   0xd   :  { %v501_v44 = vrot.slane %v841_v41, %v1003_v5  ;;  %v505_v45 = vrot.slane %v841_v41, %v1007_v7  ;;  %v569_v47 = vrot.slane %v842_v46, %v1009_v8  ;;  %v565_v48 = vrot.slane %v842_v46, %v1005_v6 }
   0xe   :  { %v577_v49 = vrot.slane %v842_v46, %v1007_v7  ;;  %v573_v50 = vrot.slane %v842_v46, %v1003_v5  ;;  %v1116_v7 = vld [vmem:[#allocation2 + $0x8] sm:$0xff]  ;;  %vm214_vm3 = vcmask 924672   ;;  %vm288_vm4 = vcmask 1039360  }
   0xf   :  { %vm317_vm5 = vcmask 7168   ;;  %vm243_vm6 = vcmask 121856   ;;  %vm169_vm7 = vcmask 130048   ;;  %vm669_vm8 = vcmask 588800  }
  0x10   :  { %134 = vrot.lane.b32.xlu1 %v123_v16, %s964_s0  ;;  %132 = vrot.lane.b32.xlu0 %v119_v17, %s964_s0 }
  0x14   :  { %138 = vrot.lane.b32.xlu1 %v131_v19, %s964_s0  ;;  %136 = vrot.lane.b32.xlu0 %v127_v20, %s964_s0 }
  0x18   :  { %208 = vrot.lane.b32.xlu1 %v197_v22, %s965_s26  ;;  %206 = vrot.lane.b32.xlu0 %v193_v23, %s965_s26 }
  0x1c   :  { %212 = vrot.lane.b32.xlu1 %v205_v24, %s965_s26  ;;  %210 = vrot.lane.b32.xlu0 %v201_v25, %s965_s26  ;;  %v1140_v25 = vld [vmem:[#allocation2 + $0x10] sm:$0xff] }
  0x20   :  { %282 = vrot.lane.b32.xlu1 %v271_v27, %s966_s29  ;;  %280 = vrot.lane.b32.xlu0 %v267_v28, %s966_s29 }
  0x24   :  { %286 = vrot.lane.b32.xlu1 %v279_v29, %s966_s29  ;;  %284 = vrot.lane.b32.xlu0 %v275_v30, %s966_s29 }
  0x28   :  { %364 = vrot.lane.b32.xlu1 %v353_v32, %s967_s6  ;;  %362 = vrot.lane.b32.xlu0 %v349_v33, %s967_s6 }
  0x2c   :  { %368 = vrot.lane.b32.xlu1 %v361_v34, %s967_s6  ;;  %366 = vrot.lane.b32.xlu0 %v357_v35, %s967_s6 }
  0x30   :  { %436 = vrot.lane.b32.xlu1 %v425_v37, %s968_s9  ;;  %434 = vrot.lane.b32.xlu0 %v421_v38, %s968_s9 }
  0x34   :  { %440 = vrot.lane.b32.xlu1 %v433_v39, %s968_s9  ;;  %438 = vrot.lane.b32.xlu0 %v429_v40, %s968_s9 }
  0x38   :  { %508 = vrot.lane.b32.xlu1 %v497_v42, %s969_s12  ;;  %506 = vrot.lane.b32.xlu0 %v493_v43, %s969_s12 }
  0x3c   :  { %510 = vrot.lane.b32.xlu0 %v501_v44, %s969_s12  ;;  %512 = vrot.lane.b32.xlu1 %v505_v45, %s969_s12 }
  0x40   :  { %580 = vrot.lane.b32.xlu1 %v569_v47, %s970_s15  ;;  %578 = vrot.lane.b32.xlu0 %v565_v48, %s970_s15 }
  0x44   :  { %584 = vrot.lane.b32.xlu1 %v577_v49, %s970_s15  ;;  %582 = vrot.lane.b32.xlu0 %v573_v50, %s970_s15  ;;  %v1166_v49 = vld [vmem:[#allocation2 + $0x28] sm:$0xff] }
  0x7a   :  { %v64_v51 = vpop.permute.xlu1 %63  ;;  %v60_v52 = vpop.permute.xlu0 %59 }
  0x7b   :  { %v76_v53 = vmul.f32 0.0, %v60_v52 }
  0x7d   :  { %86 = vrot.lane.b32.xlu0 %v76_v53, %s970_s15 }
  0x7e   :  { %v66_v54 = vpop.permute.xlu1 %65  ;;  %v62_v55 = vpop.permute.xlu0 %61 }
  0x7f   :  { %v70_v13 = vsel %vm67_vm1, %v64_v51, %v66_v54  ;;  %v80_v18 = vmul.f32 %v66_v54, %v1130_v15  ;;  %v68_v22 = vsel %vm67_vm1, %v60_v52, %v62_v55  ;;  %v69_v26 = vsel %vm67_vm1, %v62_v55, %v64_v51 }
  0x80   :  { %v79_v17 = vmul.f32 %v70_v13, %v1128_v14  ;;  %v77_v31 = vmul.f32 %v68_v22, %v1116_v7  ;;  %v78_v32 = vmul.f32 %v69_v26, %v1140_v25 }
  0x82   :  { %v135_v56 = vpop.permute.xlu1 %134  ;;  %v133_v57 = vpop.permute.xlu0 %132  ;;  %v894_v24 = vpack.i.bf16 %v80_v18, %v79_v17  ;;  %v889_v46 = vpack.i.bf16 %v78_v32, %v77_v31 }
  0x83   :  { %v149_v58 = vmul.f32 0.0, %v133_v57  ;;  %v141_v40 = vsel %vm140_vm2, %v133_v57, %v135_v56 }
  0x84   :  { %v150_v47 = vmul.f32 %v141_v40, %v1116_v7 }
  0x85   :  { %159 = vrot.lane.b32.xlu1 %v149_v58, %s969_s12 }
  0x86   :  { %v139_v59 = vpop.permute.xlu1 %138  ;;  %v137_v60 = vpop.permute.xlu0 %136 }
  0x87   :  { %v143_v21 = vsel %vm140_vm2, %v137_v60, %v139_v59  ;;  %v153_v27 = vmul.f32 %v139_v59, %v1130_v15  ;;  %v142_v33 = vsel %vm140_vm2, %v135_v56, %v137_v60 }
  0x88   :  { %v152_v28 = vmul.f32 %v143_v21, %v1128_v14  ;;  %v151_v41 = vmul.f32 %v142_v33, %v1140_v25 }
  0x8a   :  { %v1102_v61 = vpop.permute.xlu1 %208  ;;  %v1104_v62 = vpop.permute.xlu0 %206  ;;  %v904_v38 = vpack.i.bf16 %v153_v27, %v152_v28  ;;  %v899_v52 = vpack.i.bf16 %v151_v41, %v150_v47 }
  0x8b   :  { %v223_v63 = vmul.f32 0.0, %v1104_v62  ;;  %v215_v51 = vsel %vm214_vm3, %v1104_v62, %v1102_v61 }
  0x8c   :  { %v224_v60 = vmul.f32 %v215_v51, %v1116_v7 }
  0x8d   :  { %233 = vrot.lane.b32.xlu0 %v223_v63, %s968_s9 }
  0x8e   :  { %v213_v0 = vpop.permute.xlu1 %212  ;;  %v211_v1 = vpop.permute.xlu0 %210 }
  0x8f   :  { %v217_v29 = vsel %vm214_vm3, %v211_v1, %v213_v0  ;;  %v227_v35 = vmul.f32 %v213_v0, %v1130_v15  ;;  %v216_v48 = vsel %vm214_vm3, %v1102_v61, %v211_v1 }
  0x90   :  { %v226_v36 = vmul.f32 %v217_v29, %v1128_v14  ;;  %v225_v53 = vmul.f32 %v216_v48, %v1140_v25 }
  0x92   :  { %v1108_v2 = vpop.permute.xlu1 %282  ;;  %v1110_v3 = vpop.permute.xlu0 %280  ;;  %v914_v45 = vpack.i.bf16 %v227_v35, %v226_v36 }
  0x93   :  { %v297_v4 = vmul.f32 0.0, %v1110_v3  ;;  %v289_v62 = vsel %vm288_vm4, %v1110_v3, %v1108_v2 }
  0x95   :  { %307 = vrot.lane.b32.xlu1 %v297_v4, %s967_s6 }
  0x96   :  { %v287_v5 = vpop.permute.xlu1 %286  ;;  %v1114_v6 = vpop.permute.xlu0 %284 }
  0x97   :  { %v291_v39 = vsel %vm288_vm4, %v1114_v6, %v287_v5  ;;  %v301_v42 = vmul.f32 %v287_v5, %v1130_v15  ;;  %v290_v58 = vsel %vm288_vm4, %v1108_v2, %v1114_v6  ;;  %v909_v5 = vpack.i.bf16 %v225_v53, %v224_v60 }
  0x98   :  { %v300_v43 = vmul.f32 %v291_v39, %v1128_v14  ;;  %v299_v0 = vmul.f32 %v290_v58, %v1140_v25  ;;  %v971_v39 = vmov 0  }
  0x99   :  { %959 = vset.pattern.permute.xlu0 %v971_v39 }
  0x9a   :  { %v1118_v8 = vpop.permute.xlu1 %364  ;;  %v1120_v9 = vpop.permute.xlu0 %362  ;;  %v924_v56 = vpack.i.bf16 %v301_v42, %v300_v43  ;;  %v663_v43 = vld [vmem:[%s1301_s2] sm:$0xff] }
  0x9b   :  { %v378_v10 = vmul.f32 %v1120_v9, %v1116_v7 }
  0x9d   :  { %388 = vrot.lane.b32.xlu0 %v378_v10, %s966_s29 }
  0x9e   :  { %v369_v11 = vpop.permute.xlu1 %368  ;;  %v1125_v12 = vpop.permute.xlu0 %366 }
  0x9f   :  { %v372_v50 = vsel %vm317_vm5, %v1125_v12, %v369_v11  ;;  %v382_v54 = vmul.f32 %v369_v11, %v1166_v49  ;;  %v371_v6 = vsel %vm317_vm5, %v1118_v8, %v1125_v12  ;;  %v298_v11 = vmul.f32 %v289_v62, %v1116_v7 }
  0xa0   :  { %v381_v55 = vmul.f32 %v372_v50, %v1130_v15  ;;  %v380_v12 = vmul.f32 %v371_v6, %v1128_v14 }
  0xa2   :  { %v435_v16 = vpop.permute.xlu0 %434  ;;  %v437_v19 = vpop.permute.xlu1 %436  ;;  %v934_v4 = vpack.i.bf16 %v382_v54, %v381_v55 }
  0xa3   :  { %v450_v20 = vmul.f32 %v435_v16, %v1116_v7  ;;  %v442_v63 = vsel %vm243_vm6, %v435_v16, %v437_v19  ;;  %v370_v16 = vsel %vm317_vm5, %v1120_v9, %v1118_v8 }
  0xa4   :  { %v451_v13 = vmul.f32 %v442_v63, %v1140_v25  ;;  %v379_v22 = vmul.f32 %v370_v16, %v1140_v25 }
  0xa5   :  { %460 = vrot.lane.b32.xlu1 %v450_v20, %s965_s26  ;;  %v919_v20 = vpack.i.bf16 %v299_v0, %v298_v11 }
  0xa6   :  { %v1138_v23 = vpop.permute.xlu0 %438  ;;  %v1146_v30 = vpop.permute.xlu1 %440  ;;  %v929_v28 = vpack.i.bf16 %v380_v12, %v379_v22 }
  0xa7   :  { %v443_v59 = vsel %vm243_vm6, %v437_v19, %v1138_v23  ;;  %v444_v21 = vsel %vm243_vm6, %v1138_v23, %v1146_v30  ;;  %v454_v9 = vmul.f32 %v1146_v30, %v1166_v49 }
  0xa8   :  { %v452_v1 = vmul.f32 %v443_v59, %v1128_v14  ;;  %v453_v26 = vmul.f32 %v444_v21, %v1130_v15 }
  0xa9   :  { %895 = vrot.lane.b32.xlu1 %v894_v24, %s970_s15 }
  0xaa   :  { %v507_v34 = vpop.permute.xlu0 %506  ;;  %v509_v44 = vpop.permute.xlu1 %508  ;;  %v939_v19 = vpack.i.bf16 %v452_v1, %v451_v13  ;;  %v944_v35 = vpack.i.bf16 %v454_v9, %v453_v26 }
  0xab   :  { %v522_v37 = vmul.f32 %v507_v34, %v1116_v7  ;;  %v514_v17 = vsel %vm169_vm7, %v507_v34, %v509_v44 }
  0xac   :  { %v523_v24 = vmul.f32 %v514_v17, %v1140_v25 }
  0xad   :  { %905 = vrot.lane.b32.xlu1 %v904_v38, %s969_s12  ;;  %532 = vrot.lane.b32.xlu0 %v522_v37, %s964_s0 }
  0xae   :  { %v513_v57 = vpop.permute.xlu1 %512  ;;  %v511_v61 = vpop.permute.xlu0 %510 }
  0xaf   :  { %v515_v10 = vsel %vm169_vm7, %v509_v44, %v511_v61  ;;  %v516_v23 = vsel %vm169_vm7, %v511_v61, %v513_v57  ;;  %v526_v30 = vmul.f32 %v513_v57, %v1166_v49 }
  0xb0   :  { %v524_v18 = vmul.f32 %v515_v10, %v1128_v14  ;;  %v525_v34 = vmul.f32 %v516_v23, %v1130_v15 }
  0xb1   :  { %915 = vrot.lane.b32.xlu1 %v914_v45, %s968_s9  ;;  %890 = vrot.lane.b32.xlu0 %v889_v46, %s970_s15 }
  0xb2   :  { %v581_v2 = vpop.permute.xlu1 %580  ;;  %v579_v3 = vpop.permute.xlu0 %578  ;;  %v949_v27 = vpack.i.bf16 %v524_v18, %v523_v24  ;;  %v954_v37 = vpack.i.bf16 %v526_v30, %v525_v34 }
  0xb3   :  { %v586_v8 = vsel %vm22_vm0, %v579_v3, %v581_v2  ;;  %v594_v40 = vmul.f32 %v579_v3, %v1116_v7 }
  0xb4   :  { %v595_v32 = vmul.f32 %v586_v8, %v1140_v25 }
  0xb5   :  { %925 = vrot.lane.b32.xlu1 %v924_v56, %s967_s6  ;;  %900 = vrot.lane.b32.xlu0 %v899_v52, %s969_s12 }
  0xb6   :  { %v585_v29 = vpop.permute.xlu1 %584  ;;  %v583_v31 = vpop.permute.xlu0 %582 }
  0xb7   :  { %v588_v33 = vsel %vm22_vm0, %v583_v31, %v585_v29  ;;  %v587_v38 = vsel %vm22_vm0, %v581_v2, %v583_v31  ;;  %v598_v42 = vmul.f32 %v585_v29, %v1166_v49 }
  0xb8   :  { %v597_v36 = vmul.f32 %v588_v33, %v1130_v15  ;;  %v596_v41 = vmul.f32 %v587_v38, %v1128_v14 }
  0xb9   :  { %935 = vrot.lane.b32.xlu1 %v934_v4, %s966_s29  ;;  %910 = vrot.lane.b32.xlu0 %v909_v5, %s968_s9 }
  0xbd   :  { %940 = vrot.lane.b32.xlu1 %v939_v19, %s965_s26  ;;  %920 = vrot.lane.b32.xlu0 %v919_v20, %s967_s6 }
  0xc1   :  { %950 = vrot.lane.b32.xlu1 %v949_v27, %s964_s0  ;;  %930 = vrot.lane.b32.xlu0 %v929_v28, %s966_s29 }
  0xc5   :  { %606 = vrot.lane.b32.xlu1 %v595_v32, %s963_s21  ;;  %945 = vrot.lane.b32.xlu0 %v944_v35, %s965_s26 }
  0xc9   :  { %610 = vrot.lane.b32.xlu1 %v597_v36, %s963_s21  ;;  %955 = vrot.lane.b32.xlu0 %v954_v37, %s964_s0 }
  0xcd   :  { %604 = vrot.lane.b32.xlu1 %v594_v40, %s963_s21  ;;  %608 = vrot.lane.b32.xlu0 %v596_v41, %s963_s21 }
  0xd1   :  { %612 = vrot.lane.b32.xlu0 %v598_v42, %s963_s21 }
  0xd5   :  { %666 = vperm.xlu0 %959, %v663_v43  }
  0xef   :  { %v87_v45 = vpop.permute.xlu0 %86 }
  0xf7   :  { %v160_v44 = vpop.permute.xlu1 %159 }
  0xff   :  { %v234_v47 = vpop.permute.xlu0 %233 }
 0x107   :  { %v308_v46 = vpop.permute.xlu1 %307 }
 0x10f   :  { %v1241_v50 = vpop.permute.xlu0 %388 }
 0x117   :  { %v1239_v48 = vpop.permute.xlu1 %460 }
 0x11b   :  { %v896_v51 = vpop.permute.xlu1 %895 }
 0x11c   :  { %v898_v52 = vunpack.i.h.bf16 %v896_v51  ;;  %v897_v53 = vunpack.i.l.bf16 %v896_v51 }
 0x11e   :  { %v99_v57 = vsel %vm22_vm0, %v897_v53, %v898_v52 }
 0x11f   :  { %v906_v54 = vpop.permute.xlu1 %905  ;;  %v1243_v49 = vpop.permute.xlu0 %532 }
 0x120   :  { %v908_v55 = vunpack.i.h.bf16 %v906_v54  ;;  %v907_v56 = vunpack.i.l.bf16 %v906_v54 }
 0x122   :  { %v173_v58 = vsel %vm169_vm7, %v907_v56, %v908_v55 }
 0x123   :  { %v916_v59 = vpop.permute.xlu1 %915  ;;  %v891_v60 = vpop.permute.xlu0 %890  ;;  %v863_v61 = vpack.c.bf16 %v173_v58, %v99_v57 }
 0x124   :  { %v918_v62 = vunpack.i.h.bf16 %v916_v59  ;;  %v917_v63 = vunpack.i.l.bf16 %v916_v59  ;;  %v893_v0 = vunpack.i.h.bf16 %v891_v60  ;;  %v892_v1 = vunpack.i.l.bf16 %v891_v60 }
 0x125   :  { %864 = vmatprep.subr.bf16.mxu1 %v863_v61 }
 0x126   :  { %v97_v2 = vsel %vm22_vm0, %v892_v1, %v893_v0  ;;  %v98_v3 = vsel %vm22_vm0, %v893_v0, %v897_v53  ;;  %v96_v16 = vsel %vm22_vm0, %v87_v45, %v892_v1  ;;  %v247_v17 = vsel %vm243_vm6, %v917_v63, %v918_v62 }
 0x127   :  { %v926_v4 = vpop.permute.xlu1 %925  ;;  %v901_v5 = vpop.permute.xlu0 %900 }
 0x128   :  { %v928_v6 = vunpack.i.h.bf16 %v926_v4  ;;  %v927_v10 = vunpack.i.l.bf16 %v926_v4  ;;  %v903_v11 = vunpack.i.h.bf16 %v901_v5  ;;  %v902_v13 = vunpack.i.l.bf16 %v901_v5 }
 0x12a   :  { %v171_v12 = vsel %vm169_vm7, %v902_v13, %v903_v11  ;;  %v172_v18 = vsel %vm169_vm7, %v903_v11, %v907_v56  ;;  %v170_v19 = vsel %vm169_vm7, %v160_v44, %v902_v13  ;;  %v321_v20 = vsel %vm317_vm5, %v927_v10, %v928_v6 }
 0x12b   :  { %v936_v21 = vpop.permute.xlu1 %935  ;;  %v911_v22 = vpop.permute.xlu0 %910  ;;  %v847_v24 = vpack.c.bf16 %v171_v12, %v97_v2  ;;  %v865_v8 = vpack.c.bf16 %v172_v18, %v98_v3  ;;  %v849_v9 = vpack.c.bf16 %v170_v19, %v96_v16  ;;  %v867_v26 = vpack.c.bf16 %v321_v20, %v247_v17  ;;  %v626_v20 = vld [vmem:[%s1302_s1] sm:$0xff] }
 0x12c   :  { %v938_v27 = vunpack.i.h.bf16 %v936_v21  ;;  %v937_v28 = vunpack.i.l.bf16 %v936_v21  ;;  %v913_v29 = vunpack.i.h.bf16 %v911_v22  ;;  %v912_v31 = vunpack.i.l.bf16 %v911_v22 }
 0x12d   :  { %848 = vmatprep.subr.bf16.mxu0 %v847_v24  ;;  %866 = vmatpush1.bf16.msra.mxu1 %v865_v8 }
 0x12e   :  { %850 = vmatpush1.bf16.msra.mxu0 %v849_v9  ;;  %868 = vmatprep.subr.bf16.mxu1 %v867_v26  ;;  %v401_v30 = vsel %vm288_vm4, %v937_v28, %v938_v27  ;;  %v245_v36 = vsel %vm243_vm6, %v912_v31, %v913_v29  ;;  %v246_v37 = vsel %vm243_vm6, %v913_v29, %v917_v63 }
 0x12f   :  { %v941_v23 = vpop.permute.xlu1 %940  ;;  %v921_v32 = vpop.permute.xlu0 %920  ;;  %v244_v38 = vsel %vm243_vm6, %v234_v47, %v912_v31  ;;  %v871_v53 = vpack.c.bf16 %v401_v30, %v1130_v15 }
 0x130   :  { %v923_v33 = vunpack.i.h.bf16 %v921_v32  ;;  %v922_v34 = vunpack.i.l.bf16 %v921_v32  ;;  %v943_v35 = vunpack.i.h.bf16 %v941_v23  ;;  %v942_v39 = vunpack.i.l.bf16 %v941_v23 }
 0x132   :  { %v319_v40 = vsel %vm317_vm5, %v922_v34, %v923_v33  ;;  %v320_v41 = vsel %vm317_vm5, %v923_v33, %v927_v10  ;;  %v318_v42 = vsel %vm317_vm5, %v308_v46, %v922_v34  ;;  %v471_v0 = vsel %vm214_vm3, %v942_v39, %v943_v35 }
 0x133   :  { %v951_v43 = vpop.permute.xlu1 %950  ;;  %v931_v44 = vpop.permute.xlu0 %930  ;;  %v851_v45 = vpack.c.bf16 %v319_v40, %v245_v36  ;;  %v869_v51 = vpack.c.bf16 %v320_v41, %v246_v37  ;;  %v853_v52 = vpack.c.bf16 %v318_v42, %v244_v38 }
 0x134   :  { %v953_v54 = vunpack.i.h.bf16 %v951_v43  ;;  %v952_v55 = vunpack.i.l.bf16 %v951_v43  ;;  %v933_v56 = vunpack.i.h.bf16 %v931_v44  ;;  %v932_v57 = vunpack.i.l.bf16 %v931_v44 }
 0x135   :  { %852 = vmatprep.subr.bf16.mxu0 %v851_v45  ;;  %870 = vmatpush1.bf16.msra.mxu1 %v869_v51 }
 0x136   :  { %854 = vmatpush1.bf16.msra.mxu0 %v853_v52  ;;  %872 = vmatprep.subr.bf16.mxu1 %v871_v53  ;;  %v399_v47 = vsel %vm288_vm4, %v932_v57, %v933_v56  ;;  %v400_v58 = vsel %vm288_vm4, %v933_v56, %v937_v28  ;;  %v398_v46 = vsel %vm288_vm4, %v1241_v50, %v932_v57 }
 0x137   :  { %v607_v59 = vpop.permute.xlu1 %606  ;;  %v946_v60 = vpop.permute.xlu0 %945  ;;  %v855_v61 = vpack.c.bf16 %v399_v47, %v1140_v25  ;;  %v873_v15 = vpack.c.bf16 %v400_v58, %v1128_v14  ;;  %v857_v62 = vpack.c.bf16 %v398_v46, %v1116_v7  ;;  %v543_v63 = vsel %vm140_vm2, %v952_v55, %v953_v54 }
 0x138   :  { %v859_v1 = vpack.c.bf16 %v543_v63, %v471_v0  ;;  %v542_v4 = vsel %vm140_vm2, %v1243_v49, %v952_v55  ;;  %v948_v5 = vunpack.i.h.bf16 %v946_v60  ;;  %v947_v50 = vunpack.i.l.bf16 %v946_v60 }
 0x139   :  { %856 = vmatprep.subr.bf16.mxu0 %v855_v61  ;;  %874 = vmatpush1.bf16.msra.mxu1 %v873_v15  ;;  %v470_v14 = vsel %vm214_vm3, %v1239_v48, %v942_v39 }
 0x13a   :  { %858 = vmatpush1.bf16.msra.mxu0 %v857_v62  ;;  %v861_v11 = vpack.c.bf16 %v542_v4, %v470_v14  ;;  %v473_v13 = vsel %vm214_vm3, %v947_v50, %v948_v5  ;;  %v472_v3 = vsel %vm214_vm3, %v943_v35, %v947_v50 }
 0x13b   :  { %v611_v6 = vpop.permute.xlu1 %610  ;;  %v956_v10 = vpop.permute.xlu0 %955  ;;  %860 = vmatprep.subr.bf16.mxu0 %v859_v1 }
 0x13c   :  { %v958_v7 = vunpack.i.h.bf16 %v956_v10  ;;  %v957_v25 = vunpack.i.l.bf16 %v956_v10 }
 0x13e   :  { %862 = vmatpush1.bf16.msra.mxu0 %v861_v11  ;;  %v545_v2 = vsel %vm140_vm2, %v957_v25, %v958_v7  ;;  %v544_v49 = vsel %vm140_vm2, %v953_v54, %v957_v25 }
 0x13f   :  { %v605_v16 = vpop.permute.xlu1 %604  ;;  %v609_v17 = vpop.permute.xlu0 %608  ;;  %v875_v12 = vpack.c.bf16 %v545_v2, %v473_v13  ;;  %v877_v18 = vpack.c.bf16 %v544_v49, %v472_v3 }
 0x140   :  { %v615_v19 = vsel %vm67_vm1, %v607_v59, %v609_v17  ;;  %v614_v48 = vsel %vm67_vm1, %v605_v16, %v607_v59  ;;  %v616_v24 = vsel %vm67_vm1, %v609_v17, %v611_v6 }
 0x141   :  { %689 = vmatprep.subr.mxu0 %v615_v19  ;;  %876 = vmatprep.subr.bf16.mxu1 %v875_v12 }
 0x142   :  { %690 = vmatpush1.msra.mxu0 %v614_v48  ;;  %878 = vmatpush1.bf16.msra.mxu1 %v877_v18 }
 0x143   :  { %v613_v21 = vpop.permute.xlu0 %612  ;;  %843 = vmatmul.mubr.msk.f32.vlgmr.msra.gmra.mrb[0].mxu0 %vm669_vm8, %v626_v20 }
 0x144   :  { %v617_v22 = vsel %vm67_vm1, %v611_v6, %v613_v21 }
 0x145   :  { %760 = vmatprep.subr.mxu1 %v617_v22 }
 0x146   :  { %761 = vmatpush1.msra.mxu1 %v616_v24 }
 0x147   :  { %844 = vmatmul.mubr.msk.f32.vlgmr.msra.gmra.mrb[0].mxu1 %vm669_vm8, %v626_v20 }
 0x154   :  { %v667_v8 = vpop.permute.xlu0 %666 }
 0x216   :  { %v739_v9 = vpop.f32.mrb[0].mxu0 }
 0x217   :  { %v740_v26 = vadd.f32 %v739_v9, %v667_v8  ;;  %v741_v27 = vpop.f32.mrb[1].mxu0 }
 0x218   :  { %v742_v28 = vadd.f32 %v741_v27, %v667_v8 }
 0x219   :  { %vm815_vm9 = vcmp.ge.f32.partialorder %v740_v26, 0.0  ;;  %v819_v29 = vmul.f32 0.01, %v740_v26 }
 0x21a   :  { %vm816_vm10 = vcmp.ge.f32.partialorder %v742_v28, 0.0  ;;  %v820_v31 = vmul.f32 0.01, %v742_v28  ;;  %v810_v23 = vpop.f32.mrb[0].mxu1 }
 0x21b   :  { %v823_v32 = vsel %vm815_vm9, %v740_v26, %v819_v29  ;;  %v811_v33 = vadd.f32 %v810_v23, %v667_v8  ;;  %v812_v34 = vpop.f32.mrb[1].mxu1 }
 0x21c   :  { %827 = vst [vmem:[%s1303_s4] sm:$0xff] %v823_v32  ;;  %v824_v30 = vsel %vm816_vm10, %v742_v28, %v820_v31  ;;  %v813_v35 = vadd.f32 %v812_v34, %v667_v8 }
 0x21d   :  { %828 = vst [vmem:[%s1303_s4 + $0x8] sm:$0xff] %v824_v30  ;;  %vm817_vm11 = vcmp.ge.f32.partialorder %v811_v33, 0.0  ;;  %v821_v36 = vmul.f32 0.01, %v811_v33 }
 0x21e   :  { %vm818_vm12 = vcmp.ge.f32.partialorder %v813_v35, 0.0  ;;  %v822_v37 = vmul.f32 0.01, %v813_v35 }
 0x21f   :  { %v825_v38 = vsel %vm817_vm11, %v811_v33, %v821_v36 }
 0x220   :  { %845 = vst [vmem:[%s1303_s4 + $0x10] sm:$0xff] %v825_v38  ;;  %v826_v39 = vsel %vm818_vm12, %v813_v35, %v822_v37 }
 0x221   :  { %846 = vst [vmem:[%s1303_s4 + $0x18] sm:$0xff] %v826_v39 }

</bundles_post_ra>
